<compile_context>
chip_gen: v5e
topology: v5e:2x2
jax: 0.10.0
libtpu: 0.0.40
codegen_flags: <defaults>
</compile_context>

<pallas_src>
import functools

import jax
import jax.numpy as jnp
from jax import lax
from jax.experimental import pallas as pl
from jax.experimental.pallas import tpu as pltpu


def _round_up(x: int, m: int) -> int:
    return ((x + m - 1) // m) * m


def _poly_ce_kernel(logits_ref, labels_ref, out_ref, *, epsilon: float,
                    n_valid: int, tile_n: int):
    i = pl.program_id(0)

    # Full-extent class axis: Mosaic masks its internal lane padding in the
    # reductions below, so no explicit lane-validity mask is needed.
    x = logits_ref[...].astype(jnp.float32)         # (TILE_N, C) in-kernel upcast
    lab = labels_ref[...]                           # (TILE_N, 1) int32

    # Numerically stable softmax pieces (lane reductions -> XLU, exp -> EUP).
    m = jnp.max(x, axis=-1, keepdims=True)          # (TILE_N, 1)
    xs = x - m
    ex = jnp.exp(xs)
    denom = jnp.sum(ex, axis=-1, keepdims=True)
    log_denom = jnp.log(denom)

    # One-hot "gather" of the shifted true-class logit; `col` generated once.
    col = lax.broadcasted_iota(jnp.int32, x.shape, 1)
    onehot = col == lab
    ly_s = jnp.sum(jnp.where(onehot, xs, 0.0), axis=-1, keepdims=True)  # logit_y - m

    ce = log_denom - ly_s                           # lse - logit_y
    pt = jnp.exp(ly_s - log_denom)                  # softmax prob of true class
    poly = ce + epsilon * (1.0 - pt)                # (TILE_N, 1)

    # Ragged last tile: out-of-range rows hold garbage (possibly NaN/Inf);
    # select (NOT multiply-by-mask) is NaN-safe.
    row = lax.broadcasted_iota(jnp.int32, poly.shape, 0) + i * tile_n
    poly = jnp.where(row < n_valid, poly, 0.0)

    # Per-tile partial sum -> distinct SMEM block (megacore / 2-TC safe).
    out_ref[0, 0] = jnp.sum(poly)


def poly_cross_entropy_loss(logits: jax.Array, labels: jax.Array,
                            epsilon: float = 1.0,
                            tile_n: int | None = None) -> jax.Array:
    """logits: (N, C) float (f32/bf16); labels: (N,) int. Returns scalar f32 loss."""
    n, c = logits.shape
    in_bytes = logits.dtype.itemsize
    c_phys = _round_up(c, 128)                      # physical lane width in VMEM

    # --- TILE_N selection -------------------------------------------------
    if tile_n is None:
        # ~2-4 MiB f32 working block (HBM-roofline sweet spot), cap 4096 rows.
        tile_n = (4 * 2 ** 20) // (c_phys * 4)
    tile_n = max(8, (int(tile_n) // 8) * 8)
    tile_n = min(tile_n, 4096)

    # VMEM budget: 2x logits blocks (input dtype) + 2x labels blocks
    # (lane-padded to 128) + ~4 full-tile f32 temps, under a 28 MiB budget so
    # the 32 MiB scoped limit holds on every generation (incl. v7x).
    def _tile_bytes(t: int) -> int:
        tp = _round_up(t, 16)                       # sublane padding headroom
        return (2 * tp * c_phys * in_bytes
                + 2 * tp * 128 * 4
                + 4 * tp * c_phys * 4)

    vmem_budget = 28 * 2 ** 20
    while tile_n > 8 and _tile_bytes(tile_n) > vmem_budget:
        tile_n = max(8, ((tile_n // 2) // 8) * 8)

    # v7x has 2 TensorCores: keep >= 2 grid steps when there is enough work.
    if tile_n >= n:
        if n >= 16:
            tile_n = max(8, _round_up((n + 1) // 2, 8))
        else:
            tile_n = n                              # single full-extent block
    num_tiles = -(-n // tile_n)                     # ceil(n / tile_n), no row pad

    vmem_limit = int(min(32 * 2 ** 20,
                         max(4 * 2 ** 20, _tile_bytes(tile_n) + (1 << 20))))

    labels2d = labels.astype(jnp.int32).reshape(n, 1)

    cost = pl.CostEstimate(
        flops=6 * n * c,
        transcendentals=n * c,
        bytes_accessed=n * c * in_bytes + n * 4 + num_tiles * 4,
    )

    kernel = functools.partial(_poly_ce_kernel, epsilon=float(epsilon),
                               n_valid=n, tile_n=tile_n)

    partials = pl.pallas_call(
        kernel,
        out_shape=jax.ShapeDtypeStruct((num_tiles, 1), jnp.float32),
        grid_spec=pltpu.PrefetchScalarGridSpec(
            num_scalar_prefetch=0,
            grid=(num_tiles,),
            in_specs=[
                pl.BlockSpec((tile_n, c), lambda i: (i, 0)),   # full last dim, no pad
                pl.BlockSpec((tile_n, 1), lambda i: (i, 0)),
            ],
            out_specs=pl.BlockSpec((1, 1), lambda i: (i, 0),
                                   memory_space=pltpu.SMEM),
        ),
        compiler_params=pltpu.CompilerParams(
            dimension_semantics=("parallel",),
            vmem_limit_bytes=vmem_limit,
        ),
        cost_estimate=cost,
    )(logits, labels2d)

    return jnp.sum(partials) / jnp.float32(n)


def _reference_loss(logits, labels, epsilon=1.0):
    # Pure-JAX reference for correctness checks.
    logp = jax.nn.log_softmax(logits.astype(jnp.float32), axis=-1)
    n = logits.shape[0]
    logp_y = logp[jnp.arange(n), labels]
    ce = -logp_y
    pt = jnp.exp(logp_y)
    return jnp.mean(ce + epsilon * (1.0 - pt))


if __name__ == "__main__":
    key = jax.random.PRNGKey(0)
    k1, k2, k3, k4 = jax.random.split(key, 4)

    # Small case matching the module's typical few-shot classification use.
    N, C = 8, 32
    logits = jax.random.normal(k1, (N, C), dtype=jnp.float32)
    labels = jax.random.randint(k2, (N,), 0, C, dtype=jnp.int32)
    loss = poly_cross_entropy_loss(logits, labels, epsilon=1.0)
    jax.block_until_ready(loss)
    ref = _reference_loss(logits, labels, epsilon=1.0)
    assert jnp.allclose(loss, ref, atol=1e-5, rtol=1e-5), (loss, ref)

    # Larger ragged case: non-128-multiple C, ragged last row tile, forced tiling.
    N2, C2 = 300, 200
    logits2 = jax.random.normal(k3, (N2, C2), dtype=jnp.float32)
    labels2 = jax.random.randint(k4, (N2,), 0, C2, dtype=jnp.int32)
    loss2 = poly_cross_entropy_loss(logits2, labels2, epsilon=0.5, tile_n=128)
    jax.block_until_ready(loss2)
    ref2 = _reference_loss(logits2, labels2, epsilon=0.5)
    assert jnp.allclose(loss2, ref2, atol=1e-5, rtol=1e-5), (loss2, ref2)

    # Same case with auto tile_n (exercises the 2-tile / 2-TC split path).
    loss2b = poly_cross_entropy_loss(logits2, labels2, epsilon=0.5)
    jax.block_until_ready(loss2b)
    assert jnp.allclose(loss2b, ref2, atol=1e-5, rtol=1e-5), (loss2b, ref2)

    # bf16 logits path: bf16 stays in HBM, kernel upcasts internally.
    logits_bf16 = logits2.astype(jnp.bfloat16)
    loss_bf16 = poly_cross_entropy_loss(logits_bf16, labels2, epsilon=0.5, tile_n=128)
    jax.block_until_ready(loss_bf16)
    ref_bf16 = _reference_loss(logits_bf16.astype(jnp.float32), labels2, epsilon=0.5)
    assert jnp.allclose(loss_bf16, ref_bf16, atol=1e-4, rtol=1e-4), (loss_bf16, ref_bf16)

    print("KERNEL_OK")
</pallas_src>

<mosaic_0001>
module attributes {stable_mosaic.version = 11 : i64} {
  func.func @_poly_ce_kernel(%arg0: i32, %arg1: memref<8x32xf32, #tpu.memory_space<vmem>>, %arg2: memref<8x1xi32, #tpu.memory_space<vmem>>, %arg3: memref<1x1xf32, #tpu.memory_space<smem>>) attributes {dimension_semantics = [#tpu.dimension_semantics<parallel>], iteration_bounds = array<i64: 1>, scalar_prefetch = 0 : i64, scratch_operands = 0 : i64, tpu.core_type = #tpu.core_type<tc>, window_params = [{transform_indices = @transform_0, window_bounds = array<i64: 8, 32>}, {transform_indices = @transform_1, window_bounds = array<i64: 8, 1>}, {transform_indices = @transform_2, window_bounds = array<i64: 1, 1>}]} {
    %c0 = arith.constant 0 : index
    %c0_0 = arith.constant 0 : index
    %0 = vector.load %arg1[%c0, %c0_0] : memref<8x32xf32, #tpu.memory_space<vmem>>, vector<8x32xf32>
    %c0_1 = arith.constant 0 : index
    %c0_2 = arith.constant 0 : index
    %1 = vector.load %arg2[%c0_1, %c0_2] : memref<8x1xi32, #tpu.memory_space<vmem>>, vector<8x1xi32>
    %cst = arith.constant dense<0xFF800000> : vector<8xf32>
    %2 = vector.multi_reduction <maximumf>, %0, %cst [1] : vector<8x32xf32> to vector<8xf32>
    %3 = vector.shape_cast %2 : vector<8xf32> to vector<8x1xf32>
    %4 = vector.broadcast %3 : vector<8x1xf32> to vector<8x32xf32>
    %5 = arith.subf %0, %4 : vector<8x32xf32>
    %6 = math.exp %5 : vector<8x32xf32>
    %cst_3 = arith.constant dense<0.000000e+00> : vector<8xf32>
    %7 = vector.multi_reduction <add>, %6, %cst_3 [1] : vector<8x32xf32> to vector<8xf32>
    %8 = vector.shape_cast %7 : vector<8xf32> to vector<8x1xf32>
    %9 = math.log %8 : vector<8x1xf32>
    %10 = tpu.iota {dimensions = array<i32: 1>} : vector<8x32xi32>
    %11 = vector.broadcast %1 : vector<8x1xi32> to vector<8x32xi32>
    %12 = arith.cmpi eq, %10, %11 : vector<8x32xi32>
    %cst_4 = arith.constant 0.000000e+00 : f32
    %13 = vector.broadcast %cst_4 : f32 to vector<8x32xf32>
    %14 = arith.select %12, %5, %13 : vector<8x32xi1>, vector<8x32xf32>
    %cst_5 = arith.constant dense<0.000000e+00> : vector<8xf32>
    %15 = vector.multi_reduction <add>, %14, %cst_5 [1] : vector<8x32xf32> to vector<8xf32>
    %16 = vector.shape_cast %15 : vector<8xf32> to vector<8x1xf32>
    %17 = arith.subf %9, %16 : vector<8x1xf32>
    %18 = arith.subf %16, %9 : vector<8x1xf32>
    %19 = math.exp %18 : vector<8x1xf32>
    %cst_6 = arith.constant 1.000000e+00 : f32
    %20 = vector.broadcast %cst_6 : f32 to vector<8x1xf32>
    %21 = arith.subf %20, %19 : vector<8x1xf32>
    %cst_7 = arith.constant 1.000000e+00 : f32
    %22 = vector.broadcast %cst_7 : f32 to vector<8x1xf32>
    %23 = arith.mulf %22, %21 : vector<8x1xf32>
    %24 = arith.addf %17, %23 : vector<8x1xf32>
    %25 = tpu.iota {dimensions = array<i32: 0>} : vector<8x1xi32>
    %c8_i32 = arith.constant 8 : i32
    %26 = arith.muli %arg0, %c8_i32 : i32
    %27 = vector.broadcast %26 : i32 to vector<8x1xi32>
    %28 = arith.addi %25, %27 : vector<8x1xi32>
    %c8_i32_8 = arith.constant 8 : i32
    %29 = vector.broadcast %c8_i32_8 : i32 to vector<8x1xi32>
    %30 = arith.cmpi slt, %28, %29 : vector<8x1xi32>
    %cst_9 = arith.constant 0.000000e+00 : f32
    %31 = vector.broadcast %cst_9 : f32 to vector<8x1xf32>
    %32 = arith.select %30, %24, %31 : vector<8x1xi1>, vector<8x1xf32>
    %33 = vector.shape_cast %32 : vector<8x1xf32> to vector<1x8x1xf32>
    %cst_10 = arith.constant dense<0.000000e+00> : vector<1xf32>
    %34 = vector.multi_reduction <add>, %33, %cst_10 [1, 2] : vector<1x8x1xf32> to vector<1xf32>
    %35 = vector.shape_cast %34 : vector<1xf32> to vector<1x1x1xf32>
    %36 = vector.extract %35[0, 0, 0] : f32 from vector<1x1x1xf32>
    %c0_11 = arith.constant 0 : index
    %c0_12 = arith.constant 0 : index
    %37 = memref.load %arg3[%c0_11, %c0_12] : memref<1x1xf32, #tpu.memory_space<smem>>
    memref.store %36, %arg3[%c0_11, %c0_12] : memref<1x1xf32, #tpu.memory_space<smem>>
    return
  }
  func.func @transform_0(%arg0: i32) -> (i32, i32) {
    %c0_i32 = arith.constant 0 : i32
    %c0_i32_0 = arith.constant 0 : i32
    return %arg0, %c0_i32 : i32, i32
  }
  func.func @transform_1(%arg0: i32) -> (i32, i32) {
    %c0_i32 = arith.constant 0 : i32
    %c0_i32_0 = arith.constant 0 : i32
    return %arg0, %c0_i32 : i32, i32
  }
  func.func @transform_2(%arg0: i32) -> (i32, i32) {
    %c0_i32 = arith.constant 0 : i32
    %c0_i32_0 = arith.constant 0 : i32
    return %arg0, %c0_i32 : i32, i32
  }
}

</mosaic_0001>

<bundles_post_ra>
// kernel: tpu_custom_call.1
= control target key start
LH: loop header
LB: loop body
LE: loop exit
PB: predicated region body
PF: predicated region fallthrough
CT: control target
= control target key end

     0   :  { %vm14_vm0 = vcmask 261120   ;;  %s131_s0 = inlined_call_operand.vmem [shape: f32[8,32], index: 0, kind: input, shape index: {}]   ;;  %s132_s1 = inlined_call_operand.vmem [shape: s32[8,1], index: 1, kind: input, shape index: {}]   ;;  %s133_s2 = inlined_call_operand.hbm [shape: f32[1,1], index: 2, kind: output, shape index: {}]  }
   0x1   :  { %v12_v0 = vld [vmem:[%s131_s0] sm:$0xff] }
   0x2   :  { %7 = vsyncpa [#allocation3], 0  ;;  %v15_v1 = vsel %vm14_vm0, %v12_v0, -inf  ;;  %v102_v2 = vmov 0   ;;  %v13_v3 = vld [vmem:[%s132_s1] sm:$0xff]  ;;  %v26_v9 = vlaneseq  ;;  %vm49_vm2 = vcmask 7168  }
   0x3   :  { %81 = vset.pattern.permute.xlu0 %v102_v2  ;;  %s67_s13 = sshll.u32 %s133_s2, 4  ;;  %s103_s15 = smov [#allocation2]   ;;  %s68_s13 = int_to_ptr.hbm [resolvable:$true] %s67_s13 }
   0x4   :  { %16 = vmax.xlane.f32.xlu0 %v15_v1  ;;  %v27_v10 = vand.u32 127, %v26_v9 }
  0x18   :  { %29 = vperm.xlu0 %81, %v13_v3  }
  0x77   :  { %v17_v4 = vpop.xlane.xlu0 %16 }
  0x78   :  { %v18_v5 = vsub.f32 %v12_v0, %v17_v4 }
  0x7a   :  { %v19_v6 = vmul.f32 1.442695, %v18_v5 }
  0x7c   :  { %82 = vpow2.f32 %v19_v6 }
  0x82   :  { %v83_v7 = vpop.eup %82 }
  0x83   :  { %v21_v8 = vsel %vm14_vm0, %v83_v7, 0.0 }
  0x84   :  { %22 = vadd.xlane.f32.xlu1 %v21_v8 }
  0x8a   :  { %v30_v11 = vpop.permute.xlu0 %29 }
  0x8b   :  { %vm31_vm1 = vcmp.eq.s32.totalorder %v27_v10, %v30_v11 }
  0x8c   :  { %v32_v12 = vsel %vm31_vm1, %v18_v5, 0.0 }
  0x8d   :  { %v33_v13 = vsel %vm14_vm0, %v32_v12, 0.0 }
  0x8e   :  { %34 = vadd.xlane.f32.xlu1 %v33_v13 }
  0xf7   :  { %v23_v14 = vpop.xlane.xlu1 %22 }
  0xf8   :  { %84 = vlog2.f32 %v23_v14 }
  0xfe   :  { %v85_v15 = vpop.eup %84 }
  0xff   :  { %v25_v16 = vmul.f32 0.6931472, %v85_v15 }
 0x101   :  { %v35_v17 = vpop.xlane.xlu1 %34 }
 0x102   :  { %v37_v18 = vsub.f32 %v35_v17, %v25_v16  ;;  %v36_v21 = vsub.f32 %v25_v16, %v35_v17 }
 0x104   :  { %v38_v19 = vmul.f32 1.442695, %v37_v18 }
 0x106   :  { %86 = vpow2.f32 %v38_v19 }
 0x10c   :  { %v87_v20 = vpop.eup %86 }
 0x10d   :  { %v40_v22 = vsub.f32 1.0, %v87_v20 }
 0x10f   :  { %v41_v23 = vadd.f32 %v40_v22, %v36_v21 }
 0x111   :  { %v50_v24 = vsel %vm49_vm2, %v41_v23, 0.0 }
 0x112   :  { %51 = vadd.xlane.f32.xlu2 %v50_v24 }
 0x185   :  { %v52_v25 = vpop.xlane.xlu2 %51 }
 0x186   :  { %v53_v26 = vrot.slane %v52_v25, 4 }
 0x188   :  { %v54_v27 = vadd.f32 %v53_v26, %v52_v25 }
 0x18a   :  { %v55_v28 = vrot.slane %v54_v27, 2 }
 0x18c   :  { %v56_v29 = vadd.f32 %v55_v28, %v54_v27 }
 0x18e   :  { %v57_v30 = vrot.slane %v56_v29, 1 }
 0x190   :  { %v58_v31 = vadd.f32 %v57_v30, %v56_v29 }
 0x192   :  { %77 = vpush %v58_v31 }
 0x1c3   :  { %s78_s14 = spop %77 }
 0x1c4   :  { %61 = sst [smem:[#allocation2]] %s78_s14 }
 0x1c5   :  { %70 = dma.smem_to_hbm %s103_s15, 16, %s68_s13, [#allocation3]  }
 0x1c6   :  { %100 = dma.done.wait [#allocation3], 16  }
 0x1c7   :  { %101 = vsyncadd [#allocation3], 4294967280 }
 0x1c8   :  { %75 = sfence }
 0x1c9   :  { %76 = vsyncpa [#allocation3], 1 }

</bundles_post_ra>
